<compile_context>
chip_gen: v7x
topology: tpu7x:2x2x1
jax: 0.10.0
libtpu: 0.0.40
codegen_flags: <defaults>
</compile_context>

<pallas_src>
from math import exp

import numpy as np
import jax
import jax.numpy as jnp
from jax.experimental import pallas as pl
from jax.experimental.pallas import tpu as pltpu

WINDOW_SIZE = 11
SIGMA = 1.5


def _gaussian_1d(window_size: int, sigma: float) -> np.ndarray:
    """Same construction as gaussian(): normalized 1D gaussian."""
    g = np.array(
        [exp(-((x - window_size // 2) ** 2) / float(2 * sigma ** 2)) for x in range(window_size)],
        dtype=np.float64,
    )
    return (g / g.sum()).astype(np.float32)


def _banded_matrices(ws: int, H: int, W: int):
    """Banded 1D-conv matrices so that Kh @ X @ Kw == valid separable 2D conv.

    Kw[j+dj, j] = g[dj]  -> (X @ Kw)[r, j]  = sum_dj X[r, j+dj] * g[dj]
    Kh[i, i+di] = g[di]  -> (Kh @ Y)[i, c]  = sum_di Y[i+di, c] * g[di]
    outer(g, g) is exactly the 2D window of the reference, so the composition
    reproduces F.conv2d(img, window, padding=0, groups=C) per channel.
    """
    g = _gaussian_1d(ws, SIGMA)
    Ho, Wo = H - ws + 1, W - ws + 1
    Kw = np.zeros((W, Wo), dtype=np.float32)
    Kh = np.zeros((Ho, H), dtype=np.float32)
    for j in range(Wo):
        Kw[j:j + ws, j] = g
    for i in range(Ho):
        Kh[i, i:i + ws] = g
    return Kh, Kw


def _ssim_kernel(consts_ref, img1_ref, img2_ref, kw_ref, kh_ref, out_ref, acc_ref):
    """One grid step == one (H, W) plane of the (N*C, H, W) batch."""
    i = pl.program_id(0)
    c1 = consts_ref[0, 0]
    c2 = consts_ref[0, 1]

    x = img1_ref[0]          # (H, W) f32
    y = img2_ref[0]          # (H, W) f32
    kw = kw_ref[...]         # (W, Wo) banded gaussian, resident across grid
    kh = kh_ref[...]         # (Ho, H) banded gaussian, resident across grid

    def blur(m):
        # Separable gaussian filtering as two MXU matmuls, f32 accumulation.
        h = jnp.dot(m, kw, preferred_element_type=jnp.float32)    # (H, Wo)
        return jnp.dot(kh, h, preferred_element_type=jnp.float32)  # (Ho, Wo)

    mu1 = blur(x)
    mu2 = blur(y)
    s11 = blur(x * x)
    s22 = blur(y * y)
    s12 = blur(x * y)

    mu1_sq = mu1 * mu1
    mu2_sq = mu2 * mu2
    mu1_mu2 = mu1 * mu2
    sigma1_sq = s11 - mu1_sq
    sigma2_sq = s22 - mu2_sq
    sigma12 = s12 - mu1_mu2

    v1 = 2.0 * sigma12 + c2
    v2 = sigma1_sq + sigma2_sq + c2
    ssim_map = (2.0 * mu1_mu2 + c1) * v1 / ((mu1_sq + mu2_sq + c1) * v2)

    plane_sum = jnp.sum(ssim_map)

    @pl.when(i == 0)
    def _():
        acc_ref[0] = jnp.float32(0.0)

    acc_ref[0] = acc_ref[0] + plane_sum

    @pl.when(i == pl.num_programs(0) - 1)
    def _():
        out_ref[0, 0] = acc_ref[0]


def ssim_pallas(img1, img2, window_size=WINDOW_SIZE, val_range=None):
    img1 = img1.astype(jnp.float32)
    img2 = img2.astype(jnp.float32)
    N, C, H, W = img1.shape
    ws = min(window_size, H, W)  # mirrors real_size = min(window_size, height, width)
    assert H >= ws and W >= ws
    Ho, Wo = H - ws + 1, W - ws + 1
    NC = N * C

    Kh_np, Kw_np = _banded_matrices(ws, H, W)
    Kh = jnp.asarray(Kh_np)
    Kw = jnp.asarray(Kw_np)

    # Dynamic-range logic from the reference (data-dependent -> JAX glue).
    if val_range is None:
        max_val = jnp.where(jnp.max(img1) > 128.0, 255.0, 1.0)
        min_val = jnp.where(jnp.min(img1) < -0.5, -1.0, 0.0)
        L = max_val - min_val
    else:
        L = jnp.float32(val_range)
    C1 = (0.01 * L) ** 2
    C2 = (0.03 * L) ** 2
    consts = jnp.stack([C1, C2]).reshape(1, 2).astype(jnp.float32)

    x1 = img1.reshape(NC, H, W)
    x2 = img2.reshape(NC, H, W)

    matmul_flops = 5 * (2 * H * W * Wo + 2 * Ho * H * Wo)
    ew_flops = 3 * H * W + 15 * Ho * Wo
    cost = pl.CostEstimate(
        flops=int(NC * (matmul_flops + ew_flops)),
        transcendentals=0,
        bytes_accessed=int(2 * NC * H * W * 4 + (W * Wo + Ho * H) * 4 + 4),
    )

    # TODO(synk): for very large H, add an H-tile grid axis with halo rows and
    # per-plane partial-sum outputs (enables "parallel" semantics for v7x's
    # dual TensorCores); current grid is per-plane with a carried accumulator.
    out = pl.pallas_call(
        _ssim_kernel,
        out_shape=jax.ShapeDtypeStruct((1, 1), jnp.float32),
        grid_spec=pltpu.PrefetchScalarGridSpec(
            num_scalar_prefetch=0,
            grid=(NC,),
            in_specs=[
                pl.BlockSpec((1, 2), lambda i: (0, 0),
                             memory_space=pltpu.MemorySpace.SMEM),
                pl.BlockSpec((1, H, W), lambda i: (i, 0, 0)),
                pl.BlockSpec((1, H, W), lambda i: (i, 0, 0)),
                pl.BlockSpec((W, Wo), lambda i: (0, 0)),
                pl.BlockSpec((Ho, H), lambda i: (0, 0)),
            ],
            out_specs=pl.BlockSpec((1, 1), lambda i: (0, 0),
                                   memory_space=pltpu.MemorySpace.SMEM),
            scratch_shapes=[pltpu.SMEM((1,), jnp.float32)],
        ),
        compiler_params=pltpu.CompilerParams(
            dimension_semantics=("arbitrary",)),
        cost_estimate=cost,
    )(consts, x1, x2, Kw, Kh)

    # size_average=True -> scalar mean over the whole (N, C, Ho, Wo) ssim map.
    return out[0, 0] / jnp.float32(NC * Ho * Wo)


class SSIM:
    """Mirror of the PyTorch SSIM module (forward only)."""

    def __init__(self, window_size=WINDOW_SIZE, size_average=True, val_range=None):
        self.window_size = window_size
        self.size_average = size_average
        self.val_range = val_range
        g = _gaussian_1d(window_size, SIGMA)
        # Deterministic buffer matching the torch module __init__ (shape (1,1,ws,ws)).
        self.window = np.outer(g, g)[None, None].astype(np.float32)
        # TODO(synk): size_average=False (per-sample mean) path not wired; default True is implemented.

    def __call__(self, img1, img2):
        return ssim_pallas(img1, img2, self.window_size, self.val_range)


if __name__ == "__main__":
    key = jax.random.PRNGKey(0)
    k1, k2 = jax.random.split(key)
    img1 = jax.random.uniform(k1, (2, 4, 16, 16), dtype=jnp.float32)
    img2 = jax.random.uniform(k2, (2, 4, 16, 16), dtype=jnp.float32)

    model = SSIM()
    out = model(img1, img2)
    out = jax.block_until_ready(out)
    assert out.shape == () and bool(jnp.isfinite(out))
    assert -1.0 <= float(out) <= 1.0  # SSIM is bounded
    print("KERNEL_OK")
</pallas_src>

<mosaic_0001>
module attributes {stable_mosaic.version = 11 : i64} {
  func.func @_ssim_kernel(%arg0: i32, %arg1: memref<1x2xf32, #tpu.memory_space<smem>>, %arg2: memref<1x16x16xf32, #tpu.memory_space<vmem>>, %arg3: memref<1x16x16xf32, #tpu.memory_space<vmem>>, %arg4: memref<16x6xf32, #tpu.memory_space<vmem>>, %arg5: memref<6x16xf32, #tpu.memory_space<vmem>>, %arg6: memref<1x1xf32, #tpu.memory_space<smem>>, %arg7: memref<1xf32, #tpu.memory_space<smem>>) attributes {dimension_semantics = [#tpu.dimension_semantics<arbitrary>], iteration_bounds = array<i64: 8>, scalar_prefetch = 0 : i64, scratch_operands = 1 : i64, tpu.core_type = #tpu.core_type<tc>, window_params = [{transform_indices = @transform_0, window_bounds = array<i64: 1, 2>}, {transform_indices = @transform_1, window_bounds = array<i64: 1, 16, 16>}, {transform_indices = @transform_2, window_bounds = array<i64: 1, 16, 16>}, {pipeline_mode = #tpu.pipeline_mode<synchronous>, transform_indices = @transform_3, window_bounds = array<i64: 16, 6>}, {pipeline_mode = #tpu.pipeline_mode<synchronous>, transform_indices = @transform_4, window_bounds = array<i64: 6, 16>}, {transform_indices = @transform_5, window_bounds = array<i64: 1, 1>}]} {
    %c0 = arith.constant 0 : index
    %c0_0 = arith.constant 0 : index
    %0 = memref.load %arg1[%c0, %c0_0] : memref<1x2xf32, #tpu.memory_space<smem>>
    %c0_1 = arith.constant 0 : index
    %c1 = arith.constant 1 : index
    %1 = memref.load %arg1[%c0_1, %c1] : memref<1x2xf32, #tpu.memory_space<smem>>
    %c0_2 = arith.constant 0 : index
    %c0_3 = arith.constant 0 : index
    %c0_4 = arith.constant 0 : index
    %2 = vector.load %arg2[%c0_2, %c0_3, %c0_4] : memref<1x16x16xf32, #tpu.memory_space<vmem>>, vector<1x16x16xf32>
    %3 = vector.shape_cast %2 : vector<1x16x16xf32> to vector<16x16xf32>
    %c0_5 = arith.constant 0 : index
    %c0_6 = arith.constant 0 : index
    %c0_7 = arith.constant 0 : index
    %4 = vector.load %arg3[%c0_5, %c0_6, %c0_7] : memref<1x16x16xf32, #tpu.memory_space<vmem>>, vector<1x16x16xf32>
    %5 = vector.shape_cast %4 : vector<1x16x16xf32> to vector<16x16xf32>
    %c0_8 = arith.constant 0 : index
    %c0_9 = arith.constant 0 : index
    %6 = vector.load %arg4[%c0_8, %c0_9] : memref<16x6xf32, #tpu.memory_space<vmem>>, vector<16x6xf32>
    %c0_10 = arith.constant 0 : index
    %c0_11 = arith.constant 0 : index
    %7 = vector.load %arg5[%c0_10, %c0_11] : memref<6x16xf32, #tpu.memory_space<vmem>>, vector<6x16xf32>
    %cst = arith.constant dense<0.000000e+00> : vector<16x6xf32>
    %8 = tpu.matmul %3, %6, %cst {dimension_numbers = #tpu.dot_dimension_numbers<[1], [0], [0], [1], [0, 0, 1, 1], [], []>} : vector<16x16xf32>, vector<16x6xf32>, vector<16x6xf32> -> vector<16x6xf32>
    %cst_12 = arith.constant dense<0.000000e+00> : vector<6x6xf32>
    %9 = tpu.matmul %7, %8, %cst_12 {dimension_numbers = #tpu.dot_dimension_numbers<[1], [0], [0], [1], [0, 0, 1, 1], [], []>} : vector<6x16xf32>, vector<16x6xf32>, vector<6x6xf32> -> vector<6x6xf32>
    %cst_13 = arith.constant dense<0.000000e+00> : vector<16x6xf32>
    %10 = tpu.matmul %5, %6, %cst_13 {dimension_numbers = #tpu.dot_dimension_numbers<[1], [0], [0], [1], [0, 0, 1, 1], [], []>} : vector<16x16xf32>, vector<16x6xf32>, vector<16x6xf32> -> vector<16x6xf32>
    %cst_14 = arith.constant dense<0.000000e+00> : vector<6x6xf32>
    %11 = tpu.matmul %7, %10, %cst_14 {dimension_numbers = #tpu.dot_dimension_numbers<[1], [0], [0], [1], [0, 0, 1, 1], [], []>} : vector<6x16xf32>, vector<16x6xf32>, vector<6x6xf32> -> vector<6x6xf32>
    %12 = arith.mulf %3, %3 : vector<16x16xf32>
    %cst_15 = arith.constant dense<0.000000e+00> : vector<16x6xf32>
    %13 = tpu.matmul %12, %6, %cst_15 {dimension_numbers = #tpu.dot_dimension_numbers<[1], [0], [0], [1], [0, 0, 1, 1], [], []>} : vector<16x16xf32>, vector<16x6xf32>, vector<16x6xf32> -> vector<16x6xf32>
    %cst_16 = arith.constant dense<0.000000e+00> : vector<6x6xf32>
    %14 = tpu.matmul %7, %13, %cst_16 {dimension_numbers = #tpu.dot_dimension_numbers<[1], [0], [0], [1], [0, 0, 1, 1], [], []>} : vector<6x16xf32>, vector<16x6xf32>, vector<6x6xf32> -> vector<6x6xf32>
    %15 = arith.mulf %5, %5 : vector<16x16xf32>
    %cst_17 = arith.constant dense<0.000000e+00> : vector<16x6xf32>
    %16 = tpu.matmul %15, %6, %cst_17 {dimension_numbers = #tpu.dot_dimension_numbers<[1], [0], [0], [1], [0, 0, 1, 1], [], []>} : vector<16x16xf32>, vector<16x6xf32>, vector<16x6xf32> -> vector<16x6xf32>
    %cst_18 = arith.constant dense<0.000000e+00> : vector<6x6xf32>
    %17 = tpu.matmul %7, %16, %cst_18 {dimension_numbers = #tpu.dot_dimension_numbers<[1], [0], [0], [1], [0, 0, 1, 1], [], []>} : vector<6x16xf32>, vector<16x6xf32>, vector<6x6xf32> -> vector<6x6xf32>
    %18 = arith.mulf %3, %5 : vector<16x16xf32>
    %cst_19 = arith.constant dense<0.000000e+00> : vector<16x6xf32>
    %19 = tpu.matmul %18, %6, %cst_19 {dimension_numbers = #tpu.dot_dimension_numbers<[1], [0], [0], [1], [0, 0, 1, 1], [], []>} : vector<16x16xf32>, vector<16x6xf32>, vector<16x6xf32> -> vector<16x6xf32>
    %cst_20 = arith.constant dense<0.000000e+00> : vector<6x6xf32>
    %20 = tpu.matmul %7, %19, %cst_20 {dimension_numbers = #tpu.dot_dimension_numbers<[1], [0], [0], [1], [0, 0, 1, 1], [], []>} : vector<6x16xf32>, vector<16x6xf32>, vector<6x6xf32> -> vector<6x6xf32>
    %21 = arith.mulf %9, %9 : vector<6x6xf32>
    %22 = arith.mulf %11, %11 : vector<6x6xf32>
    %23 = arith.mulf %9, %11 : vector<6x6xf32>
    %24 = arith.subf %14, %21 : vector<6x6xf32>
    %25 = arith.subf %17, %22 : vector<6x6xf32>
    %26 = arith.subf %20, %23 : vector<6x6xf32>
    %cst_21 = arith.constant 2.000000e+00 : f32
    %27 = vector.broadcast %cst_21 : f32 to vector<6x6xf32>
    %28 = arith.mulf %27, %26 : vector<6x6xf32>
    %29 = vector.broadcast %1 : f32 to vector<6x6xf32>
    %30 = arith.addf %28, %29 : vector<6x6xf32>
    %31 = arith.addf %24, %25 : vector<6x6xf32>
    %32 = vector.broadcast %1 : f32 to vector<6x6xf32>
    %33 = arith.addf %31, %32 : vector<6x6xf32>
    %cst_22 = arith.constant 2.000000e+00 : f32
    %34 = vector.broadcast %cst_22 : f32 to vector<6x6xf32>
    %35 = arith.mulf %34, %23 : vector<6x6xf32>
    %36 = vector.broadcast %0 : f32 to vector<6x6xf32>
    %37 = arith.addf %35, %36 : vector<6x6xf32>
    %38 = arith.mulf %37, %30 : vector<6x6xf32>
    %39 = arith.addf %21, %22 : vector<6x6xf32>
    %40 = vector.broadcast %0 : f32 to vector<6x6xf32>
    %41 = arith.addf %39, %40 : vector<6x6xf32>
    %42 = arith.mulf %41, %33 : vector<6x6xf32>
    %43 = arith.divf %38, %42 : vector<6x6xf32>
    %44 = vector.shape_cast %43 : vector<6x6xf32> to vector<1x6x6xf32>
    %cst_23 = arith.constant dense<0.000000e+00> : vector<1xf32>
    %45 = vector.multi_reduction <add>, %44, %cst_23 [1, 2] : vector<1x6x6xf32> to vector<1xf32>
    %46 = vector.shape_cast %45 : vector<1xf32> to vector<1x1x1xf32>
    %47 = vector.extract %46[0, 0, 0] : f32 from vector<1x1x1xf32>
    %c0_i32 = arith.constant 0 : i32
    %48 = arith.cmpi eq, %arg0, %c0_i32 : i32
    %49 = arith.extui %48 : i1 to i32
    %c0_i32_24 = arith.constant 0 : i32
    %50 = arith.cmpi ne, %49, %c0_i32_24 : i32
    scf.if %50 {
      %cst_28 = arith.constant 0.000000e+00 : f32
      %c0_29 = arith.constant 0 : index
      %57 = memref.load %arg7[%c0_29] : memref<1xf32, #tpu.memory_space<smem>>
      memref.store %cst_28, %arg7[%c0_29] : memref<1xf32, #tpu.memory_space<smem>>
    } else {
    }
    %c0_25 = arith.constant 0 : index
    %51 = memref.load %arg7[%c0_25] : memref<1xf32, #tpu.memory_space<smem>>
    %52 = arith.addf %51, %47 : f32
    %c0_26 = arith.constant 0 : index
    %53 = memref.load %arg7[%c0_26] : memref<1xf32, #tpu.memory_space<smem>>
    memref.store %52, %arg7[%c0_26] : memref<1xf32, #tpu.memory_space<smem>>
    %c7_i32 = arith.constant 7 : i32
    %54 = arith.cmpi eq, %arg0, %c7_i32 : i32
    %55 = arith.extui %54 : i1 to i32
    %c0_i32_27 = arith.constant 0 : i32
    %56 = arith.cmpi ne, %55, %c0_i32_27 : i32
    scf.if %56 {
      %c0_28 = arith.constant 0 : index
      %57 = memref.load %arg7[%c0_28] : memref<1xf32, #tpu.memory_space<smem>>
      %c0_29 = arith.constant 0 : index
      %c0_30 = arith.constant 0 : index
      %58 = memref.load %arg6[%c0_29, %c0_30] : memref<1x1xf32, #tpu.memory_space<smem>>
      memref.store %57, %arg6[%c0_29, %c0_30] : memref<1x1xf32, #tpu.memory_space<smem>>
    } else {
    }
    return
  }
  func.func @transform_0(%arg0: i32) -> (i32, i32) {
    %c0_i32 = arith.constant 0 : i32
    %c0_i32_0 = arith.constant 0 : i32
    %c0_i32_1 = arith.constant 0 : i32
    return %c0_i32, %c0_i32_0 : i32, i32
  }
  func.func @transform_1(%arg0: i32) -> (i32, i32, i32) {
    %c0_i32 = arith.constant 0 : i32
    %c0_i32_0 = arith.constant 0 : i32
    %c0_i32_1 = arith.constant 0 : i32
    return %arg0, %c0_i32, %c0_i32_0 : i32, i32, i32
  }
  func.func @transform_2(%arg0: i32) -> (i32, i32, i32) {
    %c0_i32 = arith.constant 0 : i32
    %c0_i32_0 = arith.constant 0 : i32
    %c0_i32_1 = arith.constant 0 : i32
    return %arg0, %c0_i32, %c0_i32_0 : i32, i32, i32
  }
  func.func @transform_3(%arg0: i32) -> (i32, i32) {
    %c0_i32 = arith.constant 0 : i32
    %c0_i32_0 = arith.constant 0 : i32
    %c0_i32_1 = arith.constant 0 : i32
    return %c0_i32, %c0_i32_0 : i32, i32
  }
  func.func @transform_4(%arg0: i32) -> (i32, i32) {
    %c0_i32 = arith.constant 0 : i32
    %c0_i32_0 = arith.constant 0 : i32
    %c0_i32_1 = arith.constant 0 : i32
    return %c0_i32, %c0_i32_0 : i32, i32
  }
  func.func @transform_5(%arg0: i32) -> (i32, i32) {
    %c0_i32 = arith.constant 0 : i32
    %c0_i32_0 = arith.constant 0 : i32
    %c0_i32_1 = arith.constant 0 : i32
    return %c0_i32, %c0_i32_0 : i32, i32
  }
}

</mosaic_0001>

<bundles_post_ra>
// kernel: tpu_custom_call.1
= control target key start
LH: loop header
LB: loop body
LE: loop exit
PB: predicated region body
PF: predicated region fallthrough
CT: control target
= control target key end

     0   :  { %10 = vsyncpa [#allocation6], 0  ;;  %s1873_s0 = inlined_call_operand.vmem [shape: f32[1,2], index: 0, kind: input, shape index: {}]   ;;  %s1874_s1 = inlined_call_operand.hbm [shape: f32[8,16,16], index: 1, kind: input, shape index: {}]   ;;  %s1875_s2 = inlined_call_operand.hbm [shape: f32[8,16,16], index: 2, kind: input, shape index: {}]   ;;  %s1876_s3 = inlined_call_operand.vmem [shape: f32[16,6], index: 3, kind: input, shape index: {}]   ;;  %s1877_s4 = inlined_call_operand.vmem [shape: f32[6,16], index: 4, kind: input, shape index: {}]   ;;  %s1878_s5 = inlined_call_operand.hbm [shape: f32[1,1], index: 5, kind: output, shape index: {}]  }
   0x1   :  { %11 = vsyncpa [#allocation4], 0 }
   0x2   :  { %13 = vsyncpa [#allocation4 + $0x1], 0 }
   0x3   :  { %14 = vsyncpa [#allocation9], 0 }
   0x4   :  { %16 = vsyncpa [#allocation9 + $0x1], 0 }
   0x5   :  { %17 = vsyncpa [#allocation5], 0  ;;  %s1629_s18 = smov 0   ;;  %s1631_s19 = smov 0  }
   0x6   :  { %s1633_s20 = smov 0   ;;  %s1635_s21 = smov 0  }
   0x7 LB: > { %s1198_s22 = sadd.s32 4294967295, %s1587_s21   ;;  %s1649_s23 = sadd.s32 1, %s1587_s21   ;;  %s1587_s21 = sphi %s1635_s21, %s1892_s21   ;;  %s1583_s20 = sphi %s1633_s20, %s1891_s20   ;;  %s1579_s19 = sphi %s1631_s19, %s1890_s19   ;;  %s1575_s18 = sphi %s1629_s18, %s1889_s18  }
   0x8   : > { %s48_s24 = ssub.s32 %s1587_s21, %s1649_s23  ;;  %s51_s25 = sadd.s32 1, %s1583_s20 }
   0x9   : > { %p49_p0 = scmp.eq.s32.totalorder %s48_s24, 0  ;;  %p58_p1 = scmp.ne.s32.totalorder %s1583_s20, %s1579_s19 }
   0xa   : > { %p59_p2 = scmp.eq.s32.totalorder %s1587_s21, 0  ;;  %p64_p3 = scmp.ne.s32.totalorder %s1579_s19, %s1575_s18 }
   0xb   : > { %s1659_s26 = scalar_select %p49_p0, %s1583_s20, %s51_s25  }
   0xc   : > { %p60_p4 = por %p59_p2, %p58_p1  ;;  %p1663_p5 = scmp.eq.s32.totalorder %s1198_s22, 0 }
   0xd   : > { %p1199_p6 = scmp.ge.s32.totalorder %s1587_s21, 1  ;;  %p164_p7 = scmp.lt.s32.totalorder %s1587_s21, 9 }
   0xe   : > { %p1671_p8 = por %p1663_p5, %p64_p3  ;;  %s177_s7 = sshll.u32 %s1873_s0, 4  ;;  %s178_s7 = int_to_ptr.vmem [resolvable:$true] %s177_s7 }
   0xf   : > { %p1675_p9 = pnand %p1199_p6, %p164_p7  ;;  %p1406_p11 = scmp.lt.s32.totalorder %s1587_s21, 8 }
  0x10   : > { %s1882_s28 = scalar_select %p1671_p8, 1, 0 }
  0x11   : > { %s1883_s29 = scalar_select %p1675_p9, 1, 0 }
  0x12   : > { %p1394_p10 = pneg %p1675_p9  ;;  %s1686_s8 = sand.u32 1, %s1583_s20  }
  0x13   : > { %p1694_p13 = pnand %p1406_p11, %p60_p4  ;;  %s1202_s11 = sshll.u32 %s1686_s8, 4 }
  0x14   : > { %p1690_p12 = pnand %p1394_p10, %p1663_p5  ;;  %s1454_s12 = scalar_lea.vmem %s178_s7, 16 }
  0x15   : > { %p1455_p0 = scmp.ne.s32.totalorder %s178_s7, %s1454_s12  ;;  %p1462_p6 = scmp.lt.s32.totalorder %s178_s7, %s178_s7 }
  0x16   : > { %p1456_p1 = pneg %p1690_p12  ;;  %p1463_p7 = scmp.lt.s32.totalorder %s1454_s12, %s1454_s12 }
  0x18   : > { %p1457_p2 = pnand %p1456_p1, %p1455_p0  ;;  %p1464_p8 = por %p1463_p7, %p1462_p6 }
  0x1a   : > { %p1458_p3 = pneg %p1457_p2 }
  0x1c   : > { %p1465_p9 = pnand %p1464_p8, %p1458_p3 }
  0x1e   : > { %1468 = shalt.err (!%p1465_p9)
}
  0x1f   : > { %s1589_s13 = smov [#allocation3]   ;;  %s1234_s14 = sshll.u32 %s1587_s21, 8 }
  0x20   : > { %1397 = dma.vmem_to_smem (!%p1690_p12), %s178_s7, 16, %s1589_s13, [#allocation6]  }
  0x21   : > { %s1709_s17 = scalar_lea.hbm %s1874_s1, %s1234_s14  ;;  %s198_s18 = scalar_lea.vmem [#allocation7], %s1202_s11 }
  0x22   : > { %s205_s24 = sshll.u32 %s198_s18, 4  ;;  %s195_s25 = scalar_lea.sflag [#allocation4], %s1686_s8  ;;  %s1713_s24 = int_to_ptr.vmem [resolvable:$true] %s205_s24 }
  0x23   : > { %s1469_s30 = scalar_lea.hbm %s1709_s17, 256  ;;  %p1471_p8 = pneg %p1694_p13 }
  0x24   : > { %p1470_p4 = scmp.ne.s32.totalorder %s1709_s17, %s1469_s30  ;;  %s1474_s9 = scalar_lea.hbm %s1874_s1, 2048 }
  0x25   : > { %p1475_p11 = scmp.lt.u32.totalorder %s1709_s17, %s1874_s1  ;;  %p1476_p12 = scmp.lt.u32.totalorder %s1474_s9, %s1469_s30 }
  0x26   : > { %p1472_p9 = pnand %p1471_p8, %p1470_p4  ;;  %p1478_p1 = scmp.lt.u32.totalorder %s1469_s30, %s1709_s17 }
  0x27   : > { %p1477_p0 = por %p1476_p12, %p1475_p11 }
  0x28   : > { %p1473_p10 = pneg %p1472_p9 }
  0x29   : > { %p1479_p2 = por %p1478_p1, %p1477_p0 }
  0x2b   : > { %p1480_p3 = pnand %p1479_p2, %p1473_p10 }
  0x2d   : > { %1483 = shalt.err (!%p1480_p3)
}
  0x2e   : > { %s1484_s15 = scalar_lea.vmem %s1713_s24, 256  ;;  %s1590_s16 = smov [#allocation7]  }
  0x2f   : > { %p1485_p6 = scmp.ne.s32.totalorder %s1713_s24, %s1484_s15  ;;  %s1489_s18 = sshll.u32 %s1590_s16, 4  ;;  %s1490_s18 = int_to_ptr.vmem [resolvable:$false] %s1489_s18 }
  0x30   : > { %s1491_s6 = scalar_lea.vmem %s1490_s18, 512  ;;  %p1492_p9 = scmp.lt.s32.totalorder %s1713_s24, %s1490_s18 }
  0x31   : > { %p1487_p7 = pnand %p1485_p6, %p1471_p8  ;;  %p1493_p11 = scmp.lt.s32.totalorder %s1491_s6, %s1484_s15 }
  0x33   : > { %p1488_p4 = pneg %p1487_p7  ;;  %p1494_p12 = por %p1493_p11, %p1492_p9 }
  0x35   : > { %p1495_p0 = pnand %p1494_p12, %p1488_p4 }
  0x37   : > { %1498 = shalt.err (!%p1495_p0)
}
  0x38   : > { %s1591_s30 = smov 128   ;;  %s1592_s7 = smov 8  }
  0x39   : > { %1401 = dma.hbm_to_vmem [thread:$0]  (!%p1694_p13), %s1709_s17, 256, %s1713_s24, %s195_s25, %s1591_s30, %s1591_s30, %s1592_s7  }
  0x3a   : > { %s1751_s13 = scalar_lea.hbm %s1875_s2, %s1234_s14  ;;  %s219_s15 = scalar_lea.vmem [#allocation8], %s1202_s11 }
  0x3b   : > { %s226_s16 = sshll.u32 %s219_s15, 4  ;;  %s216_s18 = scalar_lea.sflag [#allocation9], %s1686_s8  ;;  %s1755_s16 = int_to_ptr.vmem [resolvable:$true] %s226_s16 }
  0x3c   : > { %s1499_s6 = scalar_lea.hbm %s1751_s13, 256  ;;  %s1504_s14 = scalar_lea.hbm %s1875_s2, 2048 }
  0x3d   : > { %p1500_p10 = scmp.ne.s32.totalorder %s1751_s13, %s1499_s6  ;;  %p1505_p3 = scmp.lt.u32.totalorder %s1751_s13, %s1875_s2 }
  0x3e   : > { %p1506_p6 = scmp.lt.u32.totalorder %s1504_s14, %s1499_s6  ;;  %p1508_p4 = scmp.lt.u32.totalorder %s1499_s6, %s1751_s13 }
  0x3f   : > { %p1502_p1 = pnand %p1500_p10, %p1471_p8 }
  0x40   : > { %p1507_p7 = por %p1506_p6, %p1505_p3 }
  0x41   : > { %p1503_p2 = pneg %p1502_p1 }
  0x42   : > { %p1509_p9 = por %p1508_p4, %p1507_p7 }
  0x44   : > { %p1510_p11 = pnand %p1509_p9, %p1503_p2 }
  0x46   : > { %1513 = shalt.err (!%p1510_p11)
}
  0x47   : > { %s1514_s11 = scalar_lea.vmem %s1755_s16, 256  ;;  %s1593_s12 = smov [#allocation8]  }
  0x48   : > { %p1515_p12 = scmp.ne.s32.totalorder %s1755_s16, %s1514_s11  ;;  %s1519_s15 = sshll.u32 %s1593_s12, 4  ;;  %s1520_s15 = int_to_ptr.vmem [resolvable:$false] %s1519_s15 }
  0x49   : > { %s1521_s17 = scalar_lea.vmem %s1520_s15, 512  ;;  %p1522_p1 = scmp.lt.s32.totalorder %s1755_s16, %s1520_s15 }
  0x4a   : > { %p1517_p0 = pnand %p1515_p12, %p1471_p8  ;;  %p1523_p3 = scmp.lt.s32.totalorder %s1521_s17, %s1514_s11 }
  0x4c   : > { %p1518_p10 = pneg %p1517_p0  ;;  %p1524_p6 = por %p1523_p3, %p1522_p1 }
  0x4e   : > { %p1525_p7 = pnand %p1524_p6, %p1518_p10 }
  0x50   : > { %1528 = shalt.err (!%p1525_p7)
}
  0x51   : > { %1404 = dma.hbm_to_vmem [thread:$0]  (!%p1694_p13), %s1751_s13, 256, %s1755_s16, %s216_s18, %s1591_s30, %s1591_s30, %s1592_s7  }
  0x52   : > { %p1886_p8 = scmp.ne.s32.totalorder %s1883_s29, 0 }
  0x54   : > { %238 = sbr.rel (%p1886_p8) target bundleno = 785 (0x311), region = 40 }
  0x5b   : > { %1558 = dma.done.wait (%p1663_p5), [#allocation6], 16  }
  0x5c   : > { %1560 = vsyncadd (%p1663_p5), [#allocation6], 4294967280  ;;  %s244_s10 = sand.u32 1, %s1579_s19   ;;  %p1887_p2 = scmp.ne.s32.totalorder %s1882_s28, 0 }
  0x5d   : > { %s1210_s6 = sshll.u32 %s244_s10, 4  ;;  %s245_s24 = scalar_lea.sflag [#allocation4], %s244_s10 }
  0x5e   : > { %s248_s14 = scalar_lea.vmem [#allocation7], %s1210_s6 }
  0x5f   : > { %1562 = dma.done.wait (%p1887_p2), %s245_s24, 256  }
  0x60   : > { %1564 = vsyncadd (%p1887_p2), %s245_s24, 4294967040  ;;  %s254_s29 = scalar_lea.sflag [#allocation9], %s244_s10  ;;  %s257_s8 = scalar_lea.vmem [#allocation8], %s1210_s6 }
  0x61   : > { %1566 = dma.done.wait (%p1887_p2), %s254_s29, 256  }
  0x62   : > { %1568 = vsyncadd (%p1887_p2), %s254_s29, 4294967040 }
  0x63   : > { %262 = sfence }
  0x64   : > { %v291_v0 = vld [vmem:[%s1876_s3] sm:$0xff]  ;;  %v292_v1 = vld [vmem:[%s1876_s3 + $0x8] sm:$0xff]  ;;  %vm294_vm0 = vcmask 130048   ;;  %v1594_v13 = vmov 0.0|0.0   ;;  %vm1595_vm1 = vmmov 0   ;;  %v1596_v14 = vmov 0.0  }
  0x65   : > { %v287_v2 = vld [vmem:[%s248_s14] sm:$0xff]  ;;  %v1341_v3 = vpack.c.bf16 %v292_v1, %v291_v0  ;;  %v288_v4 = vld [vmem:[%s248_s14 + $0x8] sm:$0xff]  ;;  %1345 = vmatprep.subr.bf16.mxu1 %v1594_v13  ;;  %1282 = vmatprep.mubr.msk.f32.mxu1 %vm1595_vm1, %v1596_v14  ;;  %s285_s25 = sld [smem:[#allocation3]]  ;;  %s1212_s9 = sld [smem:[#allocation3 + $0x1]]  ;;  %vm1079_vm2 = vcmask 46080  }
  0x66   : > { %1275 = vmatprep.mubr.msk.f32.mxu0 %vm294_vm0, %v287_v2  ;;  %v289_v5 = vld [vmem:[%s257_s8] sm:$0xff]  ;;  %v600_v6 = vmul.f32 %v287_v2, %v287_v2  ;;  %v290_v7 = vld [vmem:[%s257_s8 + $0x8] sm:$0xff]  ;;  %v601_v8 = vmul.f32 %v288_v4, %v288_v4  ;;  %s1597_s11 = smov 0.0   ;;  %p1834_p13 = scmp.eq.s32.totalorder %s1198_s22, 7 }
  0x67   : > { %1342 = vmatprep.subr.bf16.mxu0 %v1341_v3  ;;  %v753_v9 = vmul.f32 %v289_v5, %v289_v5  ;;  %v754_v10 = vmul.f32 %v290_v7, %v290_v7  ;;  %v906_v11 = vmul.f32 %v289_v5, %v287_v2  ;;  %v907_v12 = vmul.f32 %v290_v7, %v288_v4  ;;  %v293_v19 = vld [vmem:[%s1877_s4] sm:$0x3f]  ;;  %1387 = sst [smem:[#allocation2]] (%p1663_p5), %s1597_s11  ;;  %s1529_s24 = scalar_lea.hbm %s1878_s5, 16 }
  0x68   : > { %1344 = vmatpush3.bf16.msra.mxu0 %v1341_v3  ;;  %s1096_s12 = sld [smem:[#allocation2]]  ;;  %p1530_p5 = scmp.ne.s32.totalorder %s1878_s5, %s1529_s24 }
  0x69   : > { %1349 = vmatprep.subr.bf16.mxu0 %v1341_v3  ;;  %p1535_p11 = scmp.lt.u32.totalorder %s1529_s24, %s1878_s5 }
  0x6a   : > { %p1531_p4 = pnand %p1530_p5, %p1834_p13 }
  0x6b   : > { %1276 = vmatmul.mubr.msk.f32.vlgmr.msra.gmra.mrb[0].mxu0 %vm294_vm0, %v288_v4  ;;  %v1071_v45 = vstv %s285_s25  ;;  %v1066_v46 = vstv %s1212_s9 }
  0x6c   : > { %1351 = vmatpush3.bf16.msra.mxu0 %v1341_v3  ;;  %1289 = vmatprep.mubr.msk.f32.mxu0 %vm294_vm0, %v289_v5  ;;  %p1532_p9 = pneg %p1531_p4 }
  0x6d   : > { %1356 = vmatprep.subr.bf16.mxu0 %v1341_v3 }
  0x6e   : > { %p1537_p12 = pnand %p1535_p11, %p1532_p9 }
  0x6f   : > { %1290 = vmatmul.mubr.msk.f32.vlgmr.msra.gmra.mrb[2].mxu0 %vm294_vm0, %v290_v7 }
  0x70   : > { %1358 = vmatpush3.bf16.msra.mxu0 %v1341_v3  ;;  %1303 = vmatprep.mubr.msk.f32.mxu0 %vm294_vm0, %v600_v6 }
  0x71   : > { %1363 = vmatprep.subr.bf16.mxu0 %v1341_v3 }
  0x73   : > { %1304 = vmatmul.mubr.msk.f32.vlgmr.msra.gmra.mrb[4].mxu0 %vm294_vm0, %v601_v8 }
  0x74   : > { %1365 = vmatpush3.bf16.msra.mxu0 %v1341_v3  ;;  %1317 = vmatprep.mubr.msk.f32.mxu0 %vm294_vm0, %v753_v9 }
  0x75   : > { %1370 = vmatprep.subr.bf16.mxu0 %v1341_v3 }
  0x77   : > { %1318 = vmatmul.mubr.msk.f32.vlgmr.msra.gmra.mrb[6].mxu0 %vm294_vm0, %v754_v10 }
  0x78   : > { %1372 = vmatpush3.bf16.msra.mxu0 %v1341_v3  ;;  %1331 = vmatprep.mubr.msk.f32.mxu0 %vm294_vm0, %v906_v11 }
  0x7b   : > { %1332 = vmatmul.mubr.msk.f32.vlgmr.msra.gmra.mrb[8].mxu0 %vm294_vm0, %v907_v12 }
 0x13e   : > { %v1277_v15 = vpop.f32.mrb[0].mxu0 }
 0x13f   : > { %v367_v16 = vpop.f32.mrb[1].mxu0 }
 0x140   : > { %v1346_v17 = vpack.c.bf16 %v1277_v15, %v367_v16 }
 0x142   : > { %1347 = vmatpush3.bf16.msra.mxu1 %v1346_v17  ;;  %v1291_v18 = vpop.f32.mrb[2].mxu0 }
 0x143   : > { %v521_v20 = vpop.f32.mrb[3].mxu0  ;;  %1352 = vmatprep.subr.bf16.mxu1 %v1594_v13 }
 0x144   : > { %v1353_v21 = vpack.c.bf16 %v1291_v18, %v521_v20 }
 0x145   : > { %1283 = vmatmul.mubr.msk.f32.vlgmr.msra.gmra.mrb[0].mxu1 %vm294_vm0, %v293_v19 }
 0x146   : > { %1354 = vmatpush3.bf16.msra.mxu1 %v1353_v21  ;;  %v1305_v22 = vpop.f32.mrb[4].mxu0  ;;  %1296 = vmatprep.mubr.msk.f32.mxu1 %vm1595_vm1, %v1596_v14 }
 0x147   : > { %v674_v23 = vpop.f32.mrb[5].mxu0  ;;  %1359 = vmatprep.subr.bf16.mxu1 %v1594_v13 }
 0x148   : > { %v1360_v24 = vpack.c.bf16 %v1305_v22, %v674_v23 }
 0x149   : > { %1297 = vmatmul.mubr.msk.f32.vlgmr.msra.gmra.mrb[2].mxu1 %vm294_vm0, %v293_v19 }
 0x14a   : > { %1361 = vmatpush3.bf16.msra.mxu1 %v1360_v24  ;;  %v1319_v25 = vpop.f32.mrb[6].mxu0  ;;  %1310 = vmatprep.mubr.msk.f32.mxu1 %vm1595_vm1, %v1596_v14 }
 0x14b   : > { %v827_v26 = vpop.f32.mrb[7].mxu0  ;;  %1366 = vmatprep.subr.bf16.mxu1 %v1594_v13 }
 0x14c   : > { %v1367_v27 = vpack.c.bf16 %v1319_v25, %v827_v26 }
 0x14d   : > { %1311 = vmatmul.mubr.msk.f32.vlgmr.msra.gmra.mrb[4].mxu1 %vm294_vm0, %v293_v19 }
 0x14e   : > { %1368 = vmatpush3.bf16.msra.mxu1 %v1367_v27  ;;  %v1333_v28 = vpop.f32.mrb[8].mxu0  ;;  %1324 = vmatprep.mubr.msk.f32.mxu1 %vm1595_vm1, %v1596_v14 }
 0x14f   : > { %v980_v29 = vpop.f32.mrb[9].mxu0  ;;  %1373 = vmatprep.subr.bf16.mxu1 %v1594_v13 }
 0x150   : > { %v1374_v30 = vpack.c.bf16 %v1333_v28, %v980_v29 }
 0x151   : > { %1325 = vmatmul.mubr.msk.f32.vlgmr.msra.gmra.mrb[6].mxu1 %vm294_vm0, %v293_v19 }
 0x152   : > { %1375 = vmatpush3.bf16.msra.mxu1 %v1374_v30  ;;  %1338 = vmatprep.mubr.msk.f32.mxu1 %vm1595_vm1, %v1596_v14 }
 0x155   : > { %1339 = vmatmul.mubr.msk.f32.vlgmr.msra.gmra.mrb[8].mxu1 %vm294_vm0, %v293_v19 }
 0x218   : > { %v445_v31 = vpop.f32.mrb[0].mxu1 }
 0x219   : > { %v1284_v32 = vpop.f32.mrb[1].mxu1  ;;  %v1059_v34 = vmul.f32 %v445_v31, %v445_v31 }
 0x21c   : > { %v596_v33 = vpop.f32.mrb[2].mxu1 }
 0x21d   : > { %v1060_v35 = vmul.f32 %v596_v33, %v596_v33  ;;  %v1061_v36 = vmul.f32 %v596_v33, %v445_v31  ;;  %v1298_v37 = vpop.f32.mrb[3].mxu1 }
 0x21f   : > { %v1074_v38 = vadd.f32 %v1060_v35, %v1059_v34  ;;  %v1070_v49 = vmul.f32 2.0, %v1061_v36 }
 0x220   : > { %v749_v39 = vpop.f32.mrb[4].mxu1 }
 0x221   : > { %v1062_v40 = vsub.f32 %v749_v39, %v1059_v34  ;;  %v1312_v41 = vpop.f32.mrb[5].mxu1  ;;  %v1075_v50 = vadd.f32 %v1074_v38, %v1071_v45  ;;  %v1072_v57 = vadd.f32 %v1071_v45, %v1070_v49 }
 0x224   : > { %v902_v42 = vpop.f32.mrb[6].mxu1 }
 0x225   : > { %v1063_v43 = vsub.f32 %v902_v42, %v1060_v35  ;;  %v1326_v44 = vpop.f32.mrb[7].mxu1 }
 0x227   : > { %v1068_v47 = vadd.f32 %v1063_v43, %v1062_v40 }
 0x228   : > { %v1055_v48 = vpop.f32.mrb[8].mxu1 }
 0x229   : > { %v1064_v51 = vsub.f32 %v1055_v48, %v1061_v36  ;;  %v1069_v52 = vadd.f32 %v1068_v47, %v1066_v46  ;;  %v1340_v53 = vpop.f32.mrb[9].mxu1 }
 0x22b   : > { %v1065_v54 = vmul.f32 2.0, %v1064_v51  ;;  %v1076_v55 = vmul.f32 %v1075_v50, %v1069_v52 }
 0x22d   : > { %v1067_v56 = vadd.f32 %v1066_v46, %v1065_v54  ;;  %1452 = vrcp.f32 %v1076_v55 }
 0x22f   : > { %v1073_v58 = vmul.f32 %v1072_v57, %v1067_v56 }
 0x237   : > { %v1453_v59 = vpop.eup %1452 }
 0x238   : > { %v1078_v60 = vmul.f32 %v1453_v59, %v1073_v58 }
 0x23a   : > { %v1080_v61 = vsel %vm1079_vm2, %v1078_v60, 0.0 }
 0x23b   : > { %1081 = vadd.xlane.f32.xlu0 %v1080_v61 }
 0x2c8   : > { %v1082_v62 = vpop.xlane.xlu0 %1081 }
 0x2c9   : > { %v1083_v63 = vrot.slane %v1082_v62, 4 }
 0x2cb   : > { %v1084_v0 = vadd.f32 %v1083_v63, %v1082_v62 }
 0x2cd   : > { %v1085_v1 = vrot.slane %v1084_v0, 2 }
 0x2cf   : > { %v1086_v2 = vadd.f32 %v1085_v1, %v1084_v0 }
 0x2d1   : > { %v1087_v3 = vrot.slane %v1086_v2, 1 }
 0x2d3   : > { %v1088_v4 = vadd.f32 %v1087_v3, %v1086_v2 }
 0x2d5   : > { %1376 = vpush %v1088_v4 }
 0x306   : > { %s1377_s15 = spop %1376 }
 0x307   : > { %s1097_s10 = sadd.f32 %s1377_s15, %s1096_s12 }
 0x309   : > { %1099 = sst [smem:[#allocation2]] %s1097_s10 }
 0x30a   : > { %1389 = sst [smem:[#allocation10]] (%p1834_p13), %s1097_s10 }
 0x30b   : > { %1540 = shalt.err (!%p1537_p12)
}
 0x30c   : > { %s1598_s8 = smov [#allocation10]  }
 0x30d   : > { %1391 = dma.smem_to_hbm (%p1834_p13), %s1598_s8, 16, %s1878_s5, [#allocation5]  }
 0x30e   : > { %1570 = dma.done.wait (%p1834_p13), [#allocation5], 16  }
 0x30f   : > { %1572 = vsyncadd (%p1834_p13), [#allocation5], 4294967280 }
 0x310   : > { %1120 = sfence }
 0x311 PF: > { %p20_p0 = scmp.ge.s32.totalorder %s1649_s23, 10   ;;  %s1889_s18 = smov %s1579_s19 }
 0x312   : > { %s1890_s19 = smov %s1583_s20  ;;  %s1891_s20 = smov %s1659_s26 }
 0x313   : > { %s1892_s21 = smov %s1649_s23  ;;  %22 = sbr.rel (!%p20_p0) target bundleno = 7 (0x7), region = 106 }
 0x31a   :  { %1126 = vsyncpa [#allocation4], 1 }
 0x31b   :  { %1128 = vsyncpa [#allocation4 + $0x1], 1 }
 0x31c   :  { %1129 = vsyncpa [#allocation9], 1 }
 0x31d   :  { %1131 = vsyncpa [#allocation9 + $0x1], 1 }
 0x31e   :  { %1132 = vsyncpa [#allocation5], 1 }
 0x31f   :  { %1134 = vsyncpa [#allocation5 + $0x1], 1 }
 0x320   :  { %1135 = vsyncpa [#allocation6], 1 }
 0x321   :  { %1137 = vsyncpa [#allocation6 + $0x1], 1 }

</bundles_post_ra>
